<compile_context>
chip_gen: v7x
topology: tpu7x:2x2x1
jax: 0.10.0
libtpu: 0.0.40
codegen_flags: <defaults>
</compile_context>

<pallas_src>
import functools

import jax
import jax.numpy as jnp
from jax.experimental import pallas as pl
from jax.experimental.pallas import tpu as pltpu


def _focal_loss_kernel(alpha_ref, logit_ref, target_ref, out_ref, *,
                       gamma, eps, t_total, tile_rows, n_row_tiles, needs_mask):
    t = pl.program_id(1)

    logit = logit_ref[...]                    # (Bb, C, TS, 128) f32 probabilities
    tgt = target_ref[...][:, 0]               # (Bb, TS, 128)    i32 class ids
    alpha_neg = alpha_ref[...]                # (C, 128)         f32, already -alpha

    num_class = logit.shape[1]

    # Class "gather" as a short select chain over the (static, small) class axis.
    pt = logit[:, 0]                                              # (Bb, TS, 128)
    a_c = jnp.broadcast_to(alpha_neg[0:1, :], pt.shape)           # -alpha[0]
    for c in range(1, num_class):
        m = tgt == c
        pt = jnp.where(m, logit[:, c], pt)
        a_c = jnp.where(m, alpha_neg[c:c + 1, :], a_c)

    pt = pt + eps
    logpt = a_c * jnp.log(pt)                 # = -alpha[target] * log(pt)

    one_minus = 1.0 - pt
    g = float(gamma)
    if g == int(g) and 0 <= int(g) <= 8:
        gi = int(g)
        if gi == 0:
            focal = jnp.ones_like(one_minus)
        else:
            focal = one_minus
            for _ in range(gi - 1):           # integer gamma: pure VPU multiplies
                focal = focal * one_minus
    else:
        # TODO(synk): fractional gamma with pt>1 gives NaN, same as the torch reference.
        focal = jnp.power(one_minus, g)

    loss = focal * logpt                      # = -alpha*(1-pt)^gamma*log(pt)

    # Reset this batch-block's partial sum at the start of its t sweep.
    @pl.when(t == 0)
    def _():
        out_ref[...] = jnp.zeros_like(out_ref)

    if needs_mask:
        def _masked_sum():
            s_iota = jax.lax.broadcasted_iota(jnp.int32, (tile_rows, 128), 0)
            l_iota = jax.lax.broadcasted_iota(jnp.int32, (tile_rows, 128), 1)
            pos = (t * tile_rows + s_iota) * 128 + l_iota
            # select (not multiply): NaN/garbage in padded columns cannot leak.
            return jnp.sum(jnp.where(pos < t_total, loss, 0.0))

        @pl.when(t == n_row_tiles - 1)
        def _():
            out_ref[...] += _masked_sum()

        @pl.when(t != n_row_tiles - 1)
        def _():
            out_ref[...] += jnp.sum(loss)
    else:
        out_ref[...] += jnp.sum(loss)


def focal_loss_ori(logit, target, alpha, *, gamma=2.0, eps=1e-6, size_average=True,
                   max_rows_per_block=None, vmem_block_bytes=4 * 1024 * 1024):
    """logit: (B, C, T) float probabilities; target: (B, T) integer class ids."""
    B, C, T = logit.shape
    logit = logit.astype(jnp.float32)
    target = target.astype(jnp.int32)

    # Fold the leading -1 of the loss into alpha (one negate of C numbers on host);
    # lane-broadcast it so the kernel only does vector ops (tiny C*512-byte array).
    alpha_neg = -jnp.asarray(alpha, jnp.float32).reshape(C, 1)
    alpha_neg = jnp.broadcast_to(alpha_neg, (C, 128))

    # Put T on (sublane, lane): pad to a multiple of 128 only when needed, then a
    # free row-major reshape to (B, C, R, 128) / (B, 1, R, 128).
    lanes = 128
    t_pad = -(-T // lanes) * lanes
    if t_pad != T:
        logit = jnp.pad(logit, ((0, 0), (0, 0), (0, t_pad - T)))
        target = jnp.pad(target, ((0, 0), (0, t_pad - T)))
    rows = t_pad // lanes
    logit_r = logit.reshape(B, C, rows, lanes)
    target_r = target.reshape(B, 1, rows, lanes)

    # --- tile sizing: (logits + target) block <= vmem_block_bytes; x2 pipeline
    # buffers stays well inside the default scoped VMEM on v5e/v6e and v7x. ---
    row_bytes = (C + 1) * lanes * 4              # one sublane-row of logits + target
    ts_cap = max(8, (vmem_block_bytes // row_bytes) // 8 * 8)
    if max_rows_per_block is not None:
        ts_cap = min(ts_cap, max(8, (max_rows_per_block // 8) * 8))
    if rows <= ts_cap:
        tile_rows, n_t = rows, 1                 # full dim -> any size allowed
    else:
        tile_rows, n_t = ts_cap, -(-rows // ts_cap)   # multiple of 8, ragged tail masked

    # Bundle batch rows per block when a single row is small (amortize ~0.35us/step),
    # keeping >=2 batch blocks so the "parallel" axis can span both TCs on v7x.
    bb = 1
    if n_t == 1 and B > 1:
        per_row = row_bytes * tile_rows
        max_bb = max(1, min(B, vmem_block_bytes // max(per_row, 1)))
        for d in range(max_bb, 0, -1):
            if B % d == 0 and B // d >= 2:
                bb = d
                break
    nb = B // bb

    needs_mask = (n_t * tile_rows * lanes != T)

    kernel = functools.partial(
        _focal_loss_kernel, gamma=float(gamma), eps=float(eps), t_total=T,
        tile_rows=tile_rows, n_row_tiles=n_t, needs_mask=needs_mask)

    partials = pl.pallas_call(
        kernel,
        out_shape=jax.ShapeDtypeStruct((nb, 1, 1), jnp.float32),
        grid_spec=pltpu.PrefetchScalarGridSpec(
            num_scalar_prefetch=0,
            grid=(nb, n_t),
            in_specs=[
                pl.BlockSpec((C, lanes), lambda b, t: (0, 0)),            # -alpha (resident)
                pl.BlockSpec((bb, C, tile_rows, lanes),
                             lambda b, t: (b, 0, t, 0)),                  # logits tile
                pl.BlockSpec((bb, 1, tile_rows, lanes),
                             lambda b, t: (b, 0, t, 0)),                  # target tile
            ],
            out_specs=pl.BlockSpec((1, 1, 1), lambda b, t: (b, 0, 0)),    # per-block partial
        ),
        compiler_params=pltpu.CompilerParams(
            dimension_semantics=("parallel", "arbitrary")),
    )(alpha_neg, logit_r, target_r)

    total = jnp.sum(partials)
    if size_average:
        total = total / jnp.float32(B * T)
    return total


def focal_loss_ref(logit, target, alpha, *, gamma=2.0, eps=1e-6, size_average=True):
    """Pure-JAX reference matching the PyTorch module."""
    B, C, T = logit.shape
    lf = jnp.transpose(logit, (0, 2, 1)).reshape(-1, C)
    tf = target.reshape(-1)
    pt = jnp.take_along_axis(lf, tf[:, None], axis=1)[:, 0] + eps
    logpt = jnp.asarray(alpha, jnp.float32)[tf] * jnp.log(pt)
    loss = -1.0 * jnp.power(1.0 - pt, gamma) * logpt
    return jnp.mean(loss) if size_average else jnp.sum(loss)


if __name__ == "__main__":
    key = jax.random.PRNGKey(0)
    k1, k2, k3, k4, k5, k6 = jax.random.split(key, 6)

    # --- Check 1: module defaults (num_class=2, alpha=[0.25,0.75]), small shapes ---
    alpha2 = jnp.array([0.25, 0.75], jnp.float32)
    B, C, T = 2, 2, 16
    logit = jax.nn.softmax(jax.random.normal(k1, (B, C, T), jnp.float32), axis=1)
    target = jax.random.randint(k2, (B, T), 0, C, jnp.int32)
    out = jax.block_until_ready(focal_loss_ori(logit, target, alpha2))
    ref = focal_loss_ref(logit, target, alpha2)
    assert jnp.allclose(out, ref, rtol=1e-5, atol=1e-6), (out, ref)

    # --- Check 2: odd batch, T not a multiple of 128, forced multi-tile accumulation ---
    B2, C2, T2 = 3, 2, 2000
    logit2 = jax.nn.softmax(jax.random.normal(k3, (B2, C2, T2), jnp.float32), axis=1)
    target2 = jax.random.randint(k4, (B2, T2), 0, C2, jnp.int32)
    out2 = jax.block_until_ready(
        focal_loss_ori(logit2, target2, alpha2, max_rows_per_block=8))
    ref2 = focal_loss_ref(logit2, target2, alpha2)
    assert jnp.allclose(out2, ref2, rtol=1e-5, atol=1e-6), (out2, ref2)

    # --- Check 3: 4 classes, sum reduction (size_average=False) ---
    alpha4 = jnp.array([0.1, 0.2, 0.3, 0.4], jnp.float32)
    B3, C3, T3 = 2, 4, 300
    logit3 = jax.nn.softmax(jax.random.normal(k5, (B3, C3, T3), jnp.float32), axis=1)
    target3 = jax.random.randint(k6, (B3, T3), 0, C3, jnp.int32)
    out3 = jax.block_until_ready(
        focal_loss_ori(logit3, target3, alpha4, size_average=False))
    ref3 = focal_loss_ref(logit3, target3, alpha4, size_average=False)
    assert jnp.allclose(out3, ref3, rtol=1e-5, atol=1e-4), (out3, ref3)

    print("KERNEL_OK")
</pallas_src>

<mosaic_0001>
module attributes {stable_mosaic.version = 11 : i64} {
  func.func @_focal_loss_kernel(%arg0: i32, %arg1: i32, %arg2: memref<2x128xf32, #tpu.memory_space<vmem>>, %arg3: memref<1x2x1x128xf32, #tpu.memory_space<vmem>>, %arg4: memref<1x1x1x128xi32, #tpu.memory_space<vmem>>, %arg5: memref<1x1x1xf32, #tpu.memory_space<vmem>>) attributes {dimension_semantics = [#tpu.dimension_semantics<parallel>, #tpu.dimension_semantics<arbitrary>], iteration_bounds = array<i64: 2, 1>, scalar_prefetch = 0 : i64, scratch_operands = 0 : i64, tpu.core_type = #tpu.core_type<tc>, window_params = [{pipeline_mode = #tpu.pipeline_mode<synchronous>, transform_indices = @transform_0, window_bounds = array<i64: 2, 128>}, {transform_indices = @transform_1, window_bounds = array<i64: 1, 2, 1, 128>}, {transform_indices = @transform_2, window_bounds = array<i64: 1, 1, 1, 128>}, {transform_indices = @transform_3, window_bounds = array<i64: 1, 1, 1>}]} {
    %c0 = arith.constant 0 : index
    %c0_0 = arith.constant 0 : index
    %c0_1 = arith.constant 0 : index
    %c0_2 = arith.constant 0 : index
    %0 = vector.load %arg3[%c0, %c0_0, %c0_1, %c0_2] : memref<1x2x1x128xf32, #tpu.memory_space<vmem>>, vector<1x2x1x128xf32>
    %c0_3 = arith.constant 0 : index
    %c0_4 = arith.constant 0 : index
    %c0_5 = arith.constant 0 : index
    %c0_6 = arith.constant 0 : index
    %1 = vector.load %arg4[%c0_3, %c0_4, %c0_5, %c0_6] : memref<1x1x1x128xi32, #tpu.memory_space<vmem>>, vector<1x1x1x128xi32>
    %2 = vector.shape_cast %1 : vector<1x1x1x128xi32> to vector<1x1x128xi32>
    %c0_7 = arith.constant 0 : index
    %c0_8 = arith.constant 0 : index
    %3 = vector.load %arg2[%c0_7, %c0_8] : memref<2x128xf32, #tpu.memory_space<vmem>>, vector<2x128xf32>
    %4 = vector.extract_strided_slice %0 {offsets = [0, 0, 0, 0], sizes = [1, 1, 1, 128], strides = [1, 1, 1, 1]} : vector<1x2x1x128xf32> to vector<1x1x1x128xf32>
    %5 = vector.shape_cast %4 : vector<1x1x1x128xf32> to vector<1x1x128xf32>
    %6 = vector.extract_strided_slice %3 {offsets = [0, 0], sizes = [1, 128], strides = [1, 1]} : vector<2x128xf32> to vector<1x128xf32>
    %7 = vector.shape_cast %6 : vector<1x128xf32> to vector<1x1x128xf32>
    %c1_i32 = arith.constant 1 : i32
    %8 = vector.broadcast %c1_i32 : i32 to vector<1x1x128xi32>
    %9 = arith.cmpi eq, %2, %8 : vector<1x1x128xi32>
    %10 = vector.extract_strided_slice %0 {offsets = [0, 1, 0, 0], sizes = [1, 1, 1, 128], strides = [1, 1, 1, 1]} : vector<1x2x1x128xf32> to vector<1x1x1x128xf32>
    %11 = vector.shape_cast %10 : vector<1x1x1x128xf32> to vector<1x1x128xf32>
    %12 = arith.select %9, %11, %5 : vector<1x1x128xi1>, vector<1x1x128xf32>
    %13 = vector.extract_strided_slice %3 {offsets = [1, 0], sizes = [1, 128], strides = [1, 1]} : vector<2x128xf32> to vector<1x128xf32>
    %14 = vector.shape_cast %13 : vector<1x128xf32> to vector<1x1x128xf32>
    %15 = arith.select %9, %14, %7 : vector<1x1x128xi1>, vector<1x1x128xf32>
    %cst = arith.constant 9.99999997E-7 : f32
    %16 = vector.broadcast %cst : f32 to vector<1x1x128xf32>
    %17 = arith.addf %12, %16 : vector<1x1x128xf32>
    %18 = math.log %17 : vector<1x1x128xf32>
    %19 = arith.mulf %15, %18 : vector<1x1x128xf32>
    %cst_9 = arith.constant 1.000000e+00 : f32
    %20 = vector.broadcast %cst_9 : f32 to vector<1x1x128xf32>
    %21 = arith.subf %20, %17 : vector<1x1x128xf32>
    %22 = arith.mulf %21, %21 : vector<1x1x128xf32>
    %23 = arith.mulf %22, %19 : vector<1x1x128xf32>
    %c0_i32 = arith.constant 0 : i32
    %24 = arith.cmpi eq, %arg1, %c0_i32 : i32
    %25 = arith.extui %24 : i1 to i32
    %c0_i32_10 = arith.constant 0 : i32
    %26 = arith.cmpi ne, %25, %c0_i32_10 : i32
    scf.if %26 {
      %cst_15 = arith.constant 0.000000e+00 : f32
      %33 = vector.broadcast %cst_15 : f32 to vector<1x1x1xf32>
      %c0_16 = arith.constant 0 : index
      %c0_17 = arith.constant 0 : index
      %c0_18 = arith.constant 0 : index
      %34 = vector.load %arg5[%c0_16, %c0_17, %c0_18] : memref<1x1x1xf32, #tpu.memory_space<vmem>>, vector<1x1x1xf32>
      tpu.vector_store %arg5[%c0_16, %c0_17, %c0_18], %33 {strides = array<i32>} : memref<1x1x1xf32, #tpu.memory_space<vmem>>, vector<1x1x1xf32>,
    } else {
    }
    %c0_i32_11 = arith.constant 0 : i32
    %27 = arith.cmpi eq, %arg1, %c0_i32_11 : i32
    %28 = arith.extui %27 : i1 to i32
    %c0_i32_12 = arith.constant 0 : i32
    %29 = arith.cmpi ne, %28, %c0_i32_12 : i32
    scf.if %29 {
      %c0_15 = arith.constant 0 : index
      %c0_16 = arith.constant 0 : index
      %c0_17 = arith.constant 0 : index
      %33 = vector.load %arg5[%c0_15, %c0_16, %c0_17] : memref<1x1x1xf32, #tpu.memory_space<vmem>>, vector<1x1x1xf32>
      %34 = tpu.iota {dimensions = array<i32: 0>} : vector<1x128xi32>
      %35 = tpu.iota {dimensions = array<i32: 1>} : vector<1x128xi32>
      %c1_i32_18 = arith.constant 1 : i32
      %36 = arith.muli %arg1, %c1_i32_18 : i32
      %37 = vector.broadcast %36 : i32 to vector<1x128xi32>
      %38 = arith.addi %37, %34 : vector<1x128xi32>
      %c128_i32 = arith.constant 128 : i32
      %39 = vector.broadcast %c128_i32 : i32 to vector<1x128xi32>
      %40 = arith.muli %38, %39 : vector<1x128xi32>
      %41 = arith.addi %40, %35 : vector<1x128xi32>
      %c16_i32 = arith.constant 16 : i32
      %42 = vector.broadcast %c16_i32 : i32 to vector<1x128xi32>
      %43 = arith.cmpi slt, %41, %42 : vector<1x128xi32>
      %cst_19 = arith.constant 0.000000e+00 : f32
      %44 = vector.shape_cast %43 : vector<1x128xi1> to vector<1x1x128xi1>
      %45 = vector.broadcast %cst_19 : f32 to vector<1x1x128xf32>
      %46 = arith.select %44, %23, %45 : vector<1x1x128xi1>, vector<1x1x128xf32>
      %47 = vector.shape_cast %46 : vector<1x1x128xf32> to vector<1x1x1x128xf32>
      %cst_20 = arith.constant dense<0.000000e+00> : vector<1xf32>
      %48 = vector.multi_reduction <add>, %47, %cst_20 [1, 2, 3] : vector<1x1x1x128xf32> to vector<1xf32>
      %49 = vector.shape_cast %48 : vector<1xf32> to vector<1x1x1x1xf32>
      %50 = vector.extract %49[0, 0, 0, 0] : f32 from vector<1x1x1x1xf32>
      %51 = vector.broadcast %50 : f32 to vector<1x1x1xf32>
      %52 = arith.addf %33, %51 : vector<1x1x1xf32>
      %c0_21 = arith.constant 0 : index
      %c0_22 = arith.constant 0 : index
      %c0_23 = arith.constant 0 : index
      %53 = vector.load %arg5[%c0_21, %c0_22, %c0_23] : memref<1x1x1xf32, #tpu.memory_space<vmem>>, vector<1x1x1xf32>
      tpu.vector_store %arg5[%c0_21, %c0_22, %c0_23], %52 {strides = array<i32>} : memref<1x1x1xf32, #tpu.memory_space<vmem>>, vector<1x1x1xf32>,
    } else {
    }
    %c0_i32_13 = arith.constant 0 : i32
    %30 = arith.cmpi ne, %arg1, %c0_i32_13 : i32
    %31 = arith.extui %30 : i1 to i32
    %c0_i32_14 = arith.constant 0 : i32
    %32 = arith.cmpi ne, %31, %c0_i32_14 : i32
    scf.if %32 {
      %c0_15 = arith.constant 0 : index
      %c0_16 = arith.constant 0 : index
      %c0_17 = arith.constant 0 : index
      %33 = vector.load %arg5[%c0_15, %c0_16, %c0_17] : memref<1x1x1xf32, #tpu.memory_space<vmem>>, vector<1x1x1xf32>
      %34 = vector.shape_cast %23 : vector<1x1x128xf32> to vector<1x1x1x128xf32>
      %cst_18 = arith.constant dense<0.000000e+00> : vector<1xf32>
      %35 = vector.multi_reduction <add>, %34, %cst_18 [1, 2, 3] : vector<1x1x1x128xf32> to vector<1xf32>
      %36 = vector.shape_cast %35 : vector<1xf32> to vector<1x1x1x1xf32>
      %37 = vector.extract %36[0, 0, 0, 0] : f32 from vector<1x1x1x1xf32>
      %38 = vector.broadcast %37 : f32 to vector<1x1x1xf32>
      %39 = arith.addf %33, %38 : vector<1x1x1xf32>
      %c0_19 = arith.constant 0 : index
      %c0_20 = arith.constant 0 : index
      %c0_21 = arith.constant 0 : index
      %40 = vector.load %arg5[%c0_19, %c0_20, %c0_21] : memref<1x1x1xf32, #tpu.memory_space<vmem>>, vector<1x1x1xf32>
      tpu.vector_store %arg5[%c0_19, %c0_20, %c0_21], %39 {strides = array<i32>} : memref<1x1x1xf32, #tpu.memory_space<vmem>>, vector<1x1x1xf32>,
    } else {
    }
    return
  }
  func.func @transform_0(%arg0: i32, %arg1: i32) -> (i32, i32) {
    %c0_i32 = arith.constant 0 : i32
    %c0_i32_0 = arith.constant 0 : i32
    %c0_i32_1 = arith.constant 0 : i32
    return %c0_i32, %c0_i32_0 : i32, i32
  }
  func.func @transform_1(%arg0: i32, %arg1: i32) -> (i32, i32, i32, i32) {
    %c0_i32 = arith.constant 0 : i32
    %c0_i32_0 = arith.constant 0 : i32
    %c0_i32_1 = arith.constant 0 : i32
    return %arg0, %c0_i32, %arg1, %c0_i32_0 : i32, i32, i32, i32
  }
  func.func @transform_2(%arg0: i32, %arg1: i32) -> (i32, i32, i32, i32) {
    %c0_i32 = arith.constant 0 : i32
    %c0_i32_0 = arith.constant 0 : i32
    %c0_i32_1 = arith.constant 0 : i32
    return %arg0, %c0_i32, %arg1, %c0_i32_0 : i32, i32, i32, i32
  }
  func.func @transform_3(%arg0: i32, %arg1: i32) -> (i32, i32, i32) {
    %c0_i32 = arith.constant 0 : i32
    %c0_i32_0 = arith.constant 0 : i32
    %c0_i32_1 = arith.constant 0 : i32
    return %arg0, %c0_i32, %c0_i32_0 : i32, i32, i32
  }
}

</mosaic_0001>

<bundles_post_ra>
// kernel: tpu_custom_call.1
= control target key start
LH: loop header
LB: loop body
LE: loop exit
PB: predicated region body
PF: predicated region fallthrough
CT: control target
= control target key end

     0   :  { %8 = vsyncpa [#allocation3], 0  ;;  %s820_s0 = inlined_call_operand.hbm [shape: f32[2,128], index: 0, kind: input, shape index: {}]   ;;  %s821_s1 = inlined_call_operand.hbm [shape: f32[2,2,1,128], index: 1, kind: input, shape index: {}]   ;;  %s822_s2 = inlined_call_operand.vmem [shape: s32[2,1,1,128], index: 2, kind: input, shape index: {}]   ;;  %s823_s3 = inlined_call_operand.vmem [shape: f32[2,1,1], index: 3, kind: output, shape index: {}]  }
   0x1   :  { %9 = vsyncpa [#allocation5], 0 }
   0x2   :  { %11 = vsyncpa [#allocation5 + $0x1], 0  ;;  %s643_s12 = smov 0   ;;  %s645_s13 = smov 0  }
   0x3   :  { %s647_s14 = smov 0   ;;  %s649_s15 = smov 0  }
   0x4   :  { %s651_s16 = smov 0   ;;  %s653_s17 = smov 0  }
   0x5 LB: > { %s415_s18 = sadd.s32 4294967295, %s615_s17   ;;  %s59_s19 = sadd.s32 1, %s603_s14  ;;  %s615_s17 = sphi %s653_s17, %s17_s17   ;;  %s611_s16 = sphi %s651_s16, %s843_s16   ;;  %s607_s15 = sphi %s649_s15, %s842_s15   ;;  %s603_s14 = sphi %s647_s14, %s841_s14   ;;  %s599_s13 = sphi %s645_s13, %s840_s13   ;;  %s595_s12 = sphi %s643_s12, %s839_s12  }
   0x6   : > { %p66_p0 = scmp.ne.s32.totalorder %s603_s14, %s599_s13  ;;  %p67_p1 = scmp.eq.s32.totalorder %s615_s17, 0 }
   0x7   : > { %p72_p2 = scmp.ne.s32.totalorder %s599_s13, %s595_s12  ;;  %p677_p3 = scmp.eq.s32.totalorder %s415_s18, 0 }
   0x8   : > { %p68_p4 = por %p67_p1, %p66_p0  ;;  %p417_p5 = scmp.ge.s32.totalorder %s615_s17, 1 }
   0x9   : > { %s829_s20 = scalar_select %p677_p3, 1, 0 }
   0xa   : > { %p684_p6 = por %p677_p3, %p72_p2  ;;  %p137_p7 = scmp.lt.s32.totalorder %s615_s17, 3 }
   0xb   : > { %s617_s23 = smov [#allocation2]   ;;  %p446_p10 = scmp.lt.s32.totalorder %s615_s17, 2 }
   0xc   : > { %s830_s21 = scalar_select %p684_p6, 1, 0 }
   0xd   : > { %p689_p8 = pnand %p417_p5, %p137_p7  ;;  %s150_s24 = sshll.u32 %s617_s23, 4  ;;  %s151_s24 = int_to_ptr.vmem [resolvable:$true] %s150_s24 }
   0xe   : > { %s161_s25 = sand.u32 1, %s603_s14   ;;  %p703_p12 = pnand %p446_p10, %p68_p4 }
   0xf   : > { %s831_s22 = scalar_select %p689_p8, 1, 0 }
  0x10   : > { %p437_p9 = pneg %p689_p8  ;;  %s503_s30 = scalar_lea.hbm %s820_s0, 32 }
  0x11   : > { %s833_s27 = scalar_select %p703_p12, 1, 0 }
  0x12   : > { %p699_p11 = pnand %p437_p9, %p677_p3  ;;  %p504_p13 = scmp.ne.s32.totalorder %s820_s0, %s503_s30 }
  0x13   : > { %p510_p5 = scmp.lt.u32.totalorder %s503_s30, %s820_s0 }
  0x14   : > { %p505_p0 = pneg %p699_p11 }
  0x16   : > { %p506_p1 = pnand %p505_p0, %p504_p13 }
  0x18   : > { %p507_p2 = pneg %p506_p1 }
  0x1a   : > { %p512_p4 = pnand %p510_p5, %p507_p2 }
  0x1c   : > { %515 = shalt.err (!%p512_p4)
}
  0x1d   : > { %s516_s8 = scalar_lea.vmem %s151_s24, 32  ;;  %p524_p6 = scmp.lt.s32.totalorder %s151_s24, %s151_s24 }
  0x1e   : > { %p517_p7 = scmp.ne.s32.totalorder %s151_s24, %s516_s8  ;;  %p525_p3 = scmp.lt.s32.totalorder %s516_s8, %s516_s8 }
  0x20   : > { %p519_p9 = pnand %p517_p7, %p505_p0  ;;  %p526_p8 = por %p525_p3, %p524_p6 }
  0x22   : > { %p520_p10 = pneg %p519_p9 }
  0x24   : > { %p527_p12 = pnand %p526_p8, %p520_p10 }
  0x26   : > { %530 = shalt.err (!%p527_p12)
}
  0x27   : > { %440 = dma.hbm_to_vmem [thread:$0]  (!%p699_p11), %s820_s0, 32, %s151_s24, [#allocation3]  }
  0x28   : > { %s29_s11 = sadd.s32 1, %s611_s16  ;;  %s420_s12 = sshll.u32 %s161_s25, 1 }
  0x29   : > { %p31_p13 = scmp.ge.s32.totalorder %s29_s11, 2  ;;  %s428_s18 = sshll.u32 %s611_s16, 5 }
  0x2a   : > { %s165_s23 = scalar_lea.vmem [#allocation4], %s420_s12  ;;  %s732_s30 = scalar_lea.hbm %s821_s1, %s428_s18 }
  0x2b   : > { %s173_s28 = sshll.u32 %s165_s23, 4  ;;  %s845_s11 = smov (%p31_p13, %s29_s11), 0  ;;  %s734_s28 = int_to_ptr.vmem [resolvable:$true] %s173_s28 }
  0x2c   : > { %s54_s24 = ssub.s32 %s611_s16, %s845_s11  ;;  %s744_s5 = scalar_lea.sflag [#allocation5], %s161_s25 }
  0x2d   : > { %p738_p3 = scmp.eq.s32.totalorder %s54_s24, 0  ;;  %s531_s6 = scalar_lea.hbm %s732_s30, 32 }
  0x2e   : > { %p532_p6 = scmp.ne.s32.totalorder %s732_s30, %s531_s6  ;;  %p835_p8 = scmp.ne.s32.totalorder %s833_s27, 0 }
  0x2f   : > { %s536_s9 = scalar_lea.hbm %s821_s1, 64  ;;  %p537_p1 = scmp.lt.u32.totalorder %s732_s30, %s821_s1 }
  0x30   : > { %p533_p11 = pneg %p835_p8  ;;  %p538_p2 = scmp.lt.u32.totalorder %s536_s9, %s531_s6 }
  0x31   : > { %p540_p4 = scmp.lt.u32.totalorder %s531_s6, %s732_s30 }
  0x32   : > { %p534_p12 = pnand %p533_p11, %p532_p6  ;;  %p539_p5 = por %p538_p2, %p537_p1 }
  0x34   : > { %p535_p0 = pneg %p534_p12  ;;  %p541_p7 = por %p540_p4, %p539_p5 }
  0x36   : > { %p542_p9 = pnand %p541_p7, %p535_p0 }
  0x38   : > { %545 = shalt.err (!%p542_p9)
}
  0x39   : > { %s546_s25 = scalar_lea.vmem %s734_s28, 32  ;;  %s618_s18 = smov [#allocation4]  }
  0x3a   : > { %p547_p10 = scmp.ne.s32.totalorder %s734_s28, %s546_s25  ;;  %s551_s23 = sshll.u32 %s618_s18, 4  ;;  %s552_s23 = int_to_ptr.vmem [resolvable:$false] %s551_s23 }
  0x3b   : > { %s553_s26 = scalar_lea.vmem %s552_s23, 64  ;;  %p554_p12 = scmp.lt.s32.totalorder %s734_s28, %s552_s23 }
  0x3c   : > { %p549_p13 = pnand %p547_p10, %p533_p11  ;;  %p555_p1 = scmp.lt.s32.totalorder %s553_s26, %s546_s25 }
  0x3e   : > { %p550_p6 = pneg %p549_p13  ;;  %p556_p2 = por %p555_p1, %p554_p12 }
  0x40   : > { %p557_p5 = pnand %p556_p2, %p550_p6 }
  0x42   : > { %560 = shalt.err (!%p557_p5)
}
  0x43   : > { %s619_s29 = smov 16   ;;  %s620_s24 = smov 1  }
  0x44   : > { %444 = dma.hbm_to_vmem [thread:$0]  (!%p835_p8), %s732_s30, 32, %s734_s28, %s744_s5, %s619_s29, %s619_s29, %s620_s24  }
  0x45   : > { %s777_s6 = scalar_select %p738_p3, %s603_s14, %s59_s19  }
  0x46   : > { %p836_p11 = scmp.ne.s32.totalorder %s831_s22, 0 }
  0x47   : > { %p837_p0 = scmp.ne.s32.totalorder (!%p836_p11), %s829_s20, 0 }
  0x48   : > { %194 = sbr.rel (%p836_p11) target bundleno = 320 (0x140), region = 32 }
  0x4f   : > { %586 = dma.done.wait (%p837_p0), [#allocation3], 32  }
  0x50   : > { %588 = vsyncadd (%p837_p0), [#allocation3], 4294967264  ;;  %s200_s7 = sand.u32 1, %s599_s13   ;;  %p838_p8 = scmp.ne.s32.totalorder %s830_s21, 0 }
  0x51   : > { %s425_s8 = sshll.u32 %s200_s7, 1  ;;  %s201_s9 = scalar_lea.sflag [#allocation5], %s200_s7 }
  0x52   : > { %s204_s27 = scalar_lea.vmem [#allocation4], %s425_s8 }
  0x53   : > { %590 = dma.done.wait (%p838_p8), %s201_s9, 32  }
  0x54   : > { %592 = vsyncadd (%p838_p8), %s201_s9, 4294967264  ;;  %p231_p3 = scmp.lt.s32.totalorder %s607_s15, 1  ;;  %v250_v0 = vlaneseq  ;;  %v621_v1 = vmov 1966171168   ;;  %v240_v6 = vld [vmem:[%s204_s27] sm:$0x1] }
  0x55   : > { %v248_v2 = vunpack.c.l.s4 %v621_v1  ;;  %v241_v7 = vld [vmem:[%s204_s27 + $0x1] sm:$0x1]  ;;  %v243_v9 = vld [vmem:[#allocation2] sm:$0x3]  ;;  %vm288_vm2 = vcmask 1040384   ;;  %vm275_vm3 = vcmask 0  }
  0x56   : > { %s847_s15 = smov (!%p231_p3, %s607_s15), 1  ;;  %v251_v3 = vshrl.u32 %v250_v0, 7  ;;  %v281_v15 = vand.u32 127, %v250_v0  ;;  %v622_v27 = vmov 0.0  }
  0x57   : > { %v249_v4 = vunpack.c.0.s8 %v248_v2  ;;  %s236_s22 = scalar_lea.vmem %s822_s2, %s847_s15  ;;  %s239_s30 = scalar_lea.vmem %s823_s3, %s847_s15 }
  0x58   : > { %v242_v8 = vld [vmem:[%s236_s22] sm:$0x1]  ;;  %v284_v16 = vmul.u32 128, %v251_v3  ;;  %276 = vst.msk [vmem:[%s239_s30] sm:$0x1] %vm275_vm3, %v622_v27 }
  0x59   : > { %v252_v5 = vsub.s32 %v249_v4, %v251_v3  ;;  %vm244_vm0 = vcmp.eq.s32.totalorder %v242_v8, 1 }
  0x5a   : > { %v245_v10 = vsel %vm244_vm0, %v241_v7, %v240_v6  ;;  %v285_v20 = vadd.s32 %v284_v16, %v281_v15 }
  0x5b   : > { %v253_v11 = vrot.slane %v243_v9, %v252_v5  ;;  %v264_v12 = vadd.f32 1e-06, %v245_v10 }
  0x5c   : > { %vm286_vm1 = vcmp.lt.s32.totalorder %v285_v20, 16 }
  0x5d   : > { %501 = vlog2.f32 %v264_v12  ;;  %v254_v13 = vcombine.high %v253_v11, %v253_v11  ;;  %v268_v17 = vsub.f32 1.0, %v264_v12 }
  0x5f   : > { %v261_v14 = vrot.slane %v254_v13, %v252_v5  ;;  %v269_v22 = vmul.f32 %v268_v17, %v268_v17  ;;  %v277_v35 = vld [vmem:[%s239_s30] sm:$0x1] }
  0x61   : > { %v263_v19 = vsel %vm244_vm0, %v261_v14, %v243_v9 }
  0x67   : > { %v502_v18 = vpop.eup %501 }
  0x68   : > { %v266_v21 = vmul.f32 0.6931472, %v502_v18 }
  0x6a   : > { %v267_v23 = vmul.f32 %v266_v21, %v263_v19 }
  0x6c   : > { %v270_v24 = vmul.f32 %v269_v22, %v267_v23 }
  0x6e   : > { %v287_v25 = vsel %vm286_vm1, %v270_v24, 0.0 }
  0x6f   : > { %v289_v26 = vsel %vm288_vm2, %v287_v25, 0.0 }
  0x70   : > { %290 = vadd.xlane.f32.xlu0 %v289_v26 }
  0xfd   : > { %v291_v28 = vpop.xlane.xlu0 %290 }
  0xfe   : > { %v292_v29 = vrot.slane %v291_v28, 4 }
 0x100   : > { %v293_v30 = vadd.f32 %v292_v29, %v291_v28 }
 0x102   : > { %v294_v31 = vrot.slane %v293_v30, 2 }
 0x104   : > { %v295_v32 = vadd.f32 %v294_v31, %v293_v30 }
 0x106   : > { %v296_v33 = vrot.slane %v295_v32, 1 }
 0x108   : > { %v297_v34 = vadd.f32 %v296_v33, %v295_v32 }
 0x10a   : > { %429 = vpush %v297_v34 }
 0x13b   : > { %s430_s4 = spop %429 }
 0x13c   : > { %v299_v36 = vstv %s430_s4 }
 0x13d   : > { %v300_v37 = vadd.f32 %v299_v36, %v277_v35 }
 0x13f   : > { %301 = vst.msk [vmem:[%s239_s30] sm:$0x1] %vm275_vm3, %v300_v37 }
 0x140 PF: > { %s17_s17 = sadd.s32 1, %s615_s17   ;;  %s839_s12 = smov %s599_s13 }
 0x141   : > { %p14_p4 = scmp.ge.s32.totalorder %s17_s17, 4   ;;  %s840_s13 = smov %s603_s14 }
 0x142   : > { %s841_s14 = smov %s777_s6  ;;  %s842_s15 = smov %s611_s16 }
 0x143   : > { %s843_s16 = smov %s845_s11  ;;  %16 = sbr.rel (!%p14_p4) target bundleno = 5 (0x5), region = 88 }
 0x14a   :  { %339 = vsyncpa [#allocation3], 1 }
 0x14b   :  { %341 = vsyncpa [#allocation3 + $0x1], 1 }
 0x14c   :  { %342 = vsyncpa [#allocation5], 1 }
 0x14d   :  { %344 = vsyncpa [#allocation5 + $0x1], 1 }

</bundles_post_ra>
